<compile_context>
chip_gen: v6e
topology: v6e:2x2x1
jax: 0.10.0
libtpu: 0.0.40
codegen_flags: <defaults>
</compile_context>

<pallas_src>
import jax
import jax.numpy as jnp
from jax import lax
from jax.experimental import pallas as pl
from jax.experimental.pallas import tpu as pltpu

HIDDEN = 64
LANE = 128


def _mlp_kernel(x_ref, w1_ref, b1_ref, w2_ref, b2_ref, w3_ref, b3_ref, o_ref):
    x = x_ref[...]                                             # (tb, D) f32, native layout
    # fc1: (H, D) . (tb, D)^T -> (H, tb); batch goes to the lane dim, f32 MXU acc.
    h1 = lax.dot_general(
        w1_ref[...], x,
        dimension_numbers=(((1,), (1,)), ((), ())),
        preferred_element_type=jnp.float32)
    h1 = jnp.maximum(h1 + b1_ref[...], 0.0)                    # bias + ReLU (f32)
    # fc2: (H, H) @ (H, tb) -> (H, tb).
    h2 = jnp.dot(w2_ref[...], h1, preferred_element_type=jnp.float32)
    h2 = jnp.maximum(h2 + b2_ref[...], 0.0)
    # fc3 (64 -> 1): VPU multiply + sublane reduce -> lane-dense (1, tb) row.
    logits = jnp.sum(h2 * w3_ref[...], axis=0, keepdims=True) + b3_ref[0]
    o_ref[...] = jax.nn.sigmoid(logits).astype(o_ref.dtype)    # (1, tb), full-lane store


def _choose_tb(B, D, *, vmem_budget_bytes=20 << 20, tb_cap=8192):
    """Pick a lane-aligned batch tile from the VMEM budget and the grid shape."""
    # Per-step live set (bytes per batch row): 2x double-buffered x tile (f32)
    # + 2x out row + ~3 (HIDDEN, tb) f32 intermediates.
    bytes_per_row = 4 * (2 * D + 2 + 3 * HIDDEN)
    tb = min(tb_cap, vmem_budget_bytes // bytes_per_row, pl.cdiv(B, LANE) * LANE)
    tb = max(LANE, (tb // LANE) * LANE)
    # v7x's two TensorCores split the 'parallel' grid axis: ensure >= 2 steps,
    # and prefer >= 4 steps as long as the tile stays >= 1024 lanes (so the
    # ~0.35 us/step pipeline overhead stays amortized on 1-TC chips).
    while tb > LANE and pl.cdiv(B, tb) < 2:
        tb = max(LANE, (tb // 2) // LANE * LANE)
    while tb > 1024 and pl.cdiv(B, tb) < 4:
        tb = max(1024, (tb // 2) // LANE * LANE)
    return tb


def predict_net_forward(x, params, *, tb=None):
    """x: (B, input_dim) float32.  Returns (B, 1) float32."""
    w1, b1, w2, b2, w3, b3 = params          # PyTorch orientation: w1 (H, D), ...
    B, D = x.shape
    H = w1.shape[0]

    if tb is None:
        tb = _choose_tb(B, D)
    tb = max(LANE, (tb // LANE) * LANE)
    Bp = pl.cdiv(B, tb) * tb
    grid = Bp // tb

    # x stays in its native (B, D) f32 layout; pad rows only for ragged batches.
    if Bp != B:
        x = jnp.pad(x, ((0, Bp - B), (0, 0)))

    w1c = w1.astype(jnp.float32)
    w2c = w2.astype(jnp.float32)
    b1c = b1.reshape(H, 1).astype(jnp.float32)
    b2c = b2.reshape(H, 1).astype(jnp.float32)
    w3c = w3.reshape(H, 1).astype(jnp.float32)       # (1, H) -> (H, 1) column
    b3s = b3.reshape(1).astype(jnp.float32)          # SMEM scalar

    out_t = pl.pallas_call(
        _mlp_kernel,
        out_shape=jax.ShapeDtypeStruct((1, Bp), jnp.float32),
        grid_spec=pltpu.PrefetchScalarGridSpec(
            num_scalar_prefetch=0,
            grid=(grid,),
            in_specs=[
                pl.BlockSpec((tb, D), lambda i: (i, 0)),     # x tile, native layout (f32)
                pl.BlockSpec((H, D), lambda i: (0, 0)),      # W1 (resident)
                pl.BlockSpec((H, 1), lambda i: (0, 0)),      # b1 column
                pl.BlockSpec((H, H), lambda i: (0, 0)),      # W2 (resident)
                pl.BlockSpec((H, 1), lambda i: (0, 0)),      # b2 column
                pl.BlockSpec((H, 1), lambda i: (0, 0)),      # W3 column
                pl.BlockSpec(memory_space=pltpu.MemorySpace.SMEM),  # b3 scalar
            ],
            out_specs=pl.BlockSpec((1, tb), lambda i: (0, i)),
        ),
        compiler_params=pltpu.CompilerParams(
            dimension_semantics=("parallel",),
            vmem_limit_bytes=32 * 1024 * 1024,
        ),
    )(x, w1c, b1c, w2c, b2c, w3c, b3s)

    return out_t[0, :B].reshape(B, 1)


def init_params(key, input_dim):
    """Deterministic init mimicking nn.Linear (PyTorch (out, in) orientation)."""
    k1, k2, k3, k4, k5, k6 = jax.random.split(key, 6)
    s1 = 1.0 / jnp.sqrt(input_dim)
    s2 = 1.0 / jnp.sqrt(HIDDEN)
    w1 = jax.random.uniform(k1, (HIDDEN, input_dim), jnp.float32, -s1, s1)
    b1 = jax.random.uniform(k2, (HIDDEN,), jnp.float32, -s1, s1)
    w2 = jax.random.uniform(k3, (HIDDEN, HIDDEN), jnp.float32, -s2, s2)
    b2 = jax.random.uniform(k4, (HIDDEN,), jnp.float32, -s2, s2)
    w3 = jax.random.uniform(k5, (1, HIDDEN), jnp.float32, -s2, s2)
    b3 = jax.random.uniform(k6, (1,), jnp.float32, -s2, s2)
    return (w1, b1, w2, b2, w3, b3)


def predict_net_ref(x, params):
    """Pure-JAX fp32 reference matching the PyTorch module."""
    w1, b1, w2, b2, w3, b3 = params
    h1 = jax.nn.relu(jnp.dot(x, w1.T) + b1)
    h2 = jax.nn.relu(jnp.dot(h1, w2.T) + b2)
    return jax.nn.sigmoid(jnp.dot(h2, w3.T) + b3)


if __name__ == "__main__":
    key = jax.random.PRNGKey(0)
    kx1, kx2, kp = jax.random.split(key, 3)

    input_dim = 32
    params = init_params(kp, input_dim)

    # Small smoke test: single grid step, padded 16 -> 128.
    x_small = jax.random.normal(kx1, (16, input_dim), jnp.float32)
    out_small = jax.block_until_ready(predict_net_forward(x_small, params))
    ref_small = predict_net_ref(x_small, params)
    assert out_small.shape == (16, 1)
    assert jnp.max(jnp.abs(out_small - ref_small)) < 2e-3, "mismatch (small batch)"

    # Ragged multi-step batch: exercises padding + multi-step 'parallel' grid.
    x_big = jax.random.normal(kx2, (1000, input_dim), jnp.float32)
    out_big = jax.block_until_ready(predict_net_forward(x_big, params))
    ref_big = predict_net_ref(x_big, params)
    assert out_big.shape == (1000, 1)
    assert jnp.max(jnp.abs(out_big - ref_big)) < 2e-3, "mismatch (ragged batch)"

    print("KERNEL_OK")
</pallas_src>

<mosaic_0001>
module attributes {stable_mosaic.version = 11 : i64} {
  func.func @_mlp_kernel(%arg0: i32, %arg1: memref<128x32xf32, #tpu.memory_space<vmem>>, %arg2: memref<64x32xf32, #tpu.memory_space<vmem>>, %arg3: memref<64x1xf32, #tpu.memory_space<vmem>>, %arg4: memref<64x64xf32, #tpu.memory_space<vmem>>, %arg5: memref<64x1xf32, #tpu.memory_space<vmem>>, %arg6: memref<64x1xf32, #tpu.memory_space<vmem>>, %arg7: memref<1xf32, #tpu.memory_space<smem>>, %arg8: memref<1x128xf32, #tpu.memory_space<vmem>>) attributes {dimension_semantics = [#tpu.dimension_semantics<parallel>], iteration_bounds = array<i64: 1>, scalar_prefetch = 0 : i64, scratch_operands = 0 : i64, tpu.core_type = #tpu.core_type<tc>, window_params = [{transform_indices = @transform_0, window_bounds = array<i64: 128, 32>}, {pipeline_mode = #tpu.pipeline_mode<synchronous>, transform_indices = @transform_1, window_bounds = array<i64: 64, 32>}, {pipeline_mode = #tpu.pipeline_mode<synchronous>, transform_indices = @transform_2, window_bounds = array<i64: 64, 1>}, {pipeline_mode = #tpu.pipeline_mode<synchronous>, transform_indices = @transform_3, window_bounds = array<i64: 64, 64>}, {pipeline_mode = #tpu.pipeline_mode<synchronous>, transform_indices = @transform_4, window_bounds = array<i64: 64, 1>}, {pipeline_mode = #tpu.pipeline_mode<synchronous>, transform_indices = @transform_5, window_bounds = array<i64: 64, 1>}, {transform_indices = @transform_6, window_bounds = array<i64: 1>}, {transform_indices = @transform_7, window_bounds = array<i64: 1, 128>}]} {
    %c0 = arith.constant 0 : index
    %c0_0 = arith.constant 0 : index
    %0 = vector.load %arg1[%c0, %c0_0] : memref<128x32xf32, #tpu.memory_space<vmem>>, vector<128x32xf32>
    %c0_1 = arith.constant 0 : index
    %c0_2 = arith.constant 0 : index
    %1 = vector.load %arg2[%c0_1, %c0_2] : memref<64x32xf32, #tpu.memory_space<vmem>>, vector<64x32xf32>
    %cst = arith.constant dense<0.000000e+00> : vector<64x128xf32>
    %2 = tpu.matmul %1, %0, %cst {dimension_numbers = #tpu.dot_dimension_numbers<[1], [1], [0], [0], [0, 0, 1, 0], [], []>} : vector<64x32xf32>, vector<128x32xf32>, vector<64x128xf32> -> vector<64x128xf32>
    %c0_3 = arith.constant 0 : index
    %c0_4 = arith.constant 0 : index
    %3 = vector.load %arg3[%c0_3, %c0_4] : memref<64x1xf32, #tpu.memory_space<vmem>>, vector<64x1xf32>
    %4 = vector.broadcast %3 : vector<64x1xf32> to vector<64x128xf32>
    %5 = arith.addf %2, %4 : vector<64x128xf32>
    %cst_5 = arith.constant 0.000000e+00 : f32
    %6 = vector.broadcast %cst_5 : f32 to vector<64x128xf32>
    %7 = arith.maximumf %5, %6 : vector<64x128xf32>
    %c0_6 = arith.constant 0 : index
    %c0_7 = arith.constant 0 : index
    %8 = vector.load %arg4[%c0_6, %c0_7] : memref<64x64xf32, #tpu.memory_space<vmem>>, vector<64x64xf32>
    %cst_8 = arith.constant dense<0.000000e+00> : vector<64x128xf32>
    %9 = tpu.matmul %8, %7, %cst_8 {dimension_numbers = #tpu.dot_dimension_numbers<[1], [0], [0], [1], [0, 0, 1, 1], [], []>} : vector<64x64xf32>, vector<64x128xf32>, vector<64x128xf32> -> vector<64x128xf32>
    %c0_9 = arith.constant 0 : index
    %c0_10 = arith.constant 0 : index
    %10 = vector.load %arg5[%c0_9, %c0_10] : memref<64x1xf32, #tpu.memory_space<vmem>>, vector<64x1xf32>
    %11 = vector.broadcast %10 : vector<64x1xf32> to vector<64x128xf32>
    %12 = arith.addf %9, %11 : vector<64x128xf32>
    %cst_11 = arith.constant 0.000000e+00 : f32
    %13 = vector.broadcast %cst_11 : f32 to vector<64x128xf32>
    %14 = arith.maximumf %12, %13 : vector<64x128xf32>
    %c0_12 = arith.constant 0 : index
    %c0_13 = arith.constant 0 : index
    %15 = vector.load %arg6[%c0_12, %c0_13] : memref<64x1xf32, #tpu.memory_space<vmem>>, vector<64x1xf32>
    %16 = vector.broadcast %15 : vector<64x1xf32> to vector<64x128xf32>
    %17 = arith.mulf %14, %16 : vector<64x128xf32>
    %cst_14 = arith.constant dense<0.000000e+00> : vector<128xf32>
    %18 = vector.multi_reduction <add>, %17, %cst_14 [0] : vector<64x128xf32> to vector<128xf32>
    %19 = vector.shape_cast %18 : vector<128xf32> to vector<1x128xf32>
    %c0_15 = arith.constant 0 : index
    %20 = memref.load %arg7[%c0_15] : memref<1xf32, #tpu.memory_space<smem>>
    %21 = vector.broadcast %20 : f32 to vector<1x128xf32>
    %22 = arith.addf %19, %21 : vector<1x128xf32>
    %23 = arith.negf %22 : vector<1x128xf32>
    %24 = math.exp %23 : vector<1x128xf32>
    %cst_16 = arith.constant 1.000000e+00 : f32
    %25 = vector.broadcast %cst_16 : f32 to vector<1x128xf32>
    %26 = arith.addf %25, %24 : vector<1x128xf32>
    %27 = arith.divf %25, %26 : vector<1x128xf32>
    %c0_17 = arith.constant 0 : index
    %c0_18 = arith.constant 0 : index
    %28 = vector.load %arg8[%c0_17, %c0_18] : memref<1x128xf32, #tpu.memory_space<vmem>>, vector<1x128xf32>
    tpu.vector_store %arg8[%c0_17, %c0_18], %27 {strides = array<i32>} : memref<1x128xf32, #tpu.memory_space<vmem>>, vector<1x128xf32>,
    return
  }
  func.func @transform_0(%arg0: i32) -> (i32, i32) {
    %c0_i32 = arith.constant 0 : i32
    %c0_i32_0 = arith.constant 0 : i32
    return %arg0, %c0_i32 : i32, i32
  }
  func.func @transform_1(%arg0: i32) -> (i32, i32) {
    %c0_i32 = arith.constant 0 : i32
    %c0_i32_0 = arith.constant 0 : i32
    %c0_i32_1 = arith.constant 0 : i32
    return %c0_i32, %c0_i32_0 : i32, i32
  }
  func.func @transform_2(%arg0: i32) -> (i32, i32) {
    %c0_i32 = arith.constant 0 : i32
    %c0_i32_0 = arith.constant 0 : i32
    %c0_i32_1 = arith.constant 0 : i32
    return %c0_i32, %c0_i32_0 : i32, i32
  }
  func.func @transform_3(%arg0: i32) -> (i32, i32) {
    %c0_i32 = arith.constant 0 : i32
    %c0_i32_0 = arith.constant 0 : i32
    %c0_i32_1 = arith.constant 0 : i32
    return %c0_i32, %c0_i32_0 : i32, i32
  }
  func.func @transform_4(%arg0: i32) -> (i32, i32) {
    %c0_i32 = arith.constant 0 : i32
    %c0_i32_0 = arith.constant 0 : i32
    %c0_i32_1 = arith.constant 0 : i32
    return %c0_i32, %c0_i32_0 : i32, i32
  }
  func.func @transform_5(%arg0: i32) -> (i32, i32) {
    %c0_i32 = arith.constant 0 : i32
    %c0_i32_0 = arith.constant 0 : i32
    %c0_i32_1 = arith.constant 0 : i32
    return %c0_i32, %c0_i32_0 : i32, i32
  }
  func.func @transform_6(%arg0: i32) -> i32 {
    %c0_i32 = arith.constant 0 : i32
    %c0_i32_0 = arith.constant 0 : i32
    return %c0_i32 : i32
  }
  func.func @transform_7(%arg0: i32) -> (i32, i32) {
    %c0_i32 = arith.constant 0 : i32
    %c0_i32_0 = arith.constant 0 : i32
    return %c0_i32, %arg0 : i32, i32
  }
}

</mosaic_0001>

<bundles_post_ra>
// kernel: tpu_custom_call.1
= control target key start
LH: loop header
LB: loop body
LE: loop exit
PB: predicated region body
PF: predicated region fallthrough
CT: control target
= control target key end

     0   :  { %vm100_vm0 = vcmask 261120   ;;  %v748_v2 = vmov 0   ;;  %s1012_s0 = inlined_call_operand.vmem [shape: f32[128,32], index: 0, kind: input, shape index: {}]   ;;  %s1013_s1 = inlined_call_operand.vmem [shape: f32[64,32], index: 1, kind: input, shape index: {}]   ;;  %s1014_s2 = inlined_call_operand.vmem [shape: f32[64,1], index: 2, kind: input, shape index: {}]   ;;  %s1015_s3 = inlined_call_operand.vmem [shape: f32[64,64], index: 3, kind: input, shape index: {}]   ;;  %s1016_s4 = inlined_call_operand.vmem [shape: f32[64,1], index: 4, kind: input, shape index: {}]   ;;  %s1017_s5 = inlined_call_operand.vmem [shape: f32[64,1], index: 5, kind: input, shape index: {}]   ;;  %s1018_s6 = inlined_call_operand.<no memory space> [shape: f32[1], index: 6, kind: input, shape index: {}]   ;;  %s1019_s7 = inlined_call_operand.hbm [shape: f32[1,128], index: 7, kind: output, shape index: {}]  }
   0x1   :  { %v43_v0 = vld [vmem:[%s1012_s0 + $0x78] sm:$0xff]  ;;  %v42_v1 = vld [vmem:[%s1012_s0 + $0x70] sm:$0xff]  ;;  %720 = vset.pattern.permute.xlu0 %v748_v2  ;;  %721 = vset.pattern.permute.xlu1 %v748_v2  ;;  %v41_v3 = vld [vmem:[%s1012_s0 + $0x68] sm:$0xff] }
   0x2   :  { %646 = vmatprep.subr.msk.mxu0 %vm100_vm0, %v43_v0  ;;  %v44_v4 = vld [vmem:[%s1013_s1] sm:$0xff]  ;;  %v59_v6 = vld [vmem:[%s1014_s2 + $0x38] sm:$0xff]  ;;  %v57_v7 = vld [vmem:[%s1014_s2 + $0x28] sm:$0xff] }
   0x3   :  { %647 = vmatpush3.xpose.msk.msra.mxu0 %vm100_vm0, %v43_v0  ;;  %678 = vmatprep.mubr.msk.f32.mxu0 %vm100_vm0, %v44_v4  ;;  %v40_v5 = vld [vmem:[%s1012_s0 + $0x60] sm:$0xff]  ;;  %v58_v8 = vld [vmem:[%s1014_s2 + $0x30] sm:$0xff]  ;;  %v39_v10 = vld [vmem:[%s1012_s0 + $0x58] sm:$0xff] }
   0x4   :  { %648 = vmatprep.subr.msk.mxu0 %vm100_vm0, %v42_v1  ;;  %97 = vperm.xlu0 %720, %v59_v6   ;;  %v56_v9 = vld [vmem:[%s1014_s2 + $0x20] sm:$0xff]  ;;  %v55_v11 = vld [vmem:[%s1014_s2 + $0x18] sm:$0xff]  ;;  %v54_v12 = vld [vmem:[%s1014_s2 + $0x10] sm:$0xff] }
   0x5   :  { %87 = vperm.xlu1 %721, %v57_v7   ;;  %v38_v13 = vld [vmem:[%s1012_s0 + $0x50] sm:$0xff] }
   0x7   :  { %649 = vmatpush3.xpose.msk.msra.mxu0 %vm100_vm0, %v42_v1 }
   0x8   :  { %650 = vmatprep.subr.msk.mxu0 %vm100_vm0, %v41_v3  ;;  %92 = vperm.xlu0 %720, %v58_v8  }
   0x9   :  { %82 = vperm.xlu1 %721, %v56_v9  }
   0xb   :  { %651 = vmatpush3.xpose.msk.msra.mxu0 %vm100_vm0, %v41_v3 }
   0xc   :  { %652 = vmatprep.subr.msk.mxu0 %vm100_vm0, %v40_v5 }
   0xf   :  { %653 = vmatpush3.xpose.msk.msra.mxu0 %vm100_vm0, %v40_v5 }
  0x10   :  { %654 = vmatprep.subr.msk.mxu0 %vm100_vm0, %v39_v10 }
  0x11   :  { %13 = vsyncpa [#allocation4], 0  ;;  %77 = vperm.xlu0 %720, %v55_v11   ;;  %72 = vperm.xlu1 %721, %v54_v12   ;;  %v53_v14 = vld [vmem:[%s1014_s2 + $0x8] sm:$0xff]  ;;  %v52_v15 = vld [vmem:[%s1014_s2] sm:$0xff]  ;;  %vm342_vm1 = vcmask 523264   ;;  %s749_s13 = smov [#allocation3]  }
  0x12   :  { %v37_v16 = vld [vmem:[%s1012_s0 + $0x48] sm:$0xff]  ;;  %v294_v17 = vld [vmem:[%s1016_s4] sm:$0xff]  ;;  %v296_v20 = vld [vmem:[%s1016_s4 + $0x10] sm:$0xff]  ;;  %s565_s2 = sshll.u32 %s749_s13, 4  ;;  %s566_s2 = int_to_ptr.vmem [resolvable:$true] %s565_s2 }
  0x13   :  { %655 = vmatpush3.xpose.msk.msra.mxu0 %vm100_vm0, %v39_v10  ;;  %v295_v18 = vld [vmem:[%s1016_s4 + $0x8] sm:$0xff]  ;;  %v36_v19 = vld [vmem:[%s1012_s0 + $0x40] sm:$0xff]  ;;  %v297_v21 = vld [vmem:[%s1016_s4 + $0x18] sm:$0xff]  ;;  %s730_s14 = scalar_lea.vmem %s566_s2, 32  ;;  %p731_p1 = scmp.lt.s32.totalorder %s566_s2, %s566_s2 }
  0x14   :  { %656 = vmatprep.subr.msk.mxu0 %vm100_vm0, %v38_v13  ;;  %v35_v22 = vld [vmem:[%s1012_s0 + $0x38] sm:$0xff]  ;;  %v480_v23 = vld [vmem:[%s1017_s5] sm:$0xff]  ;;  %v481_v24 = vld [vmem:[%s1017_s5 + $0x8] sm:$0xff] }
  0x15   :  { %67 = vperm.xlu0 %720, %v53_v14   ;;  %62 = vperm.xlu1 %721, %v52_v15   ;;  %v34_v25 = vld [vmem:[%s1012_s0 + $0x30] sm:$0xff]  ;;  %v298_v26 = vld [vmem:[%s1016_s4 + $0x20] sm:$0xff]  ;;  %v33_v28 = vld [vmem:[%s1012_s0 + $0x28] sm:$0xff] }
  0x16   :  { %v482_v27 = vld [vmem:[%s1017_s5 + $0x10] sm:$0xff]  ;;  %v299_v29 = vld [vmem:[%s1016_s4 + $0x28] sm:$0xff]  ;;  %v483_v30 = vld [vmem:[%s1017_s5 + $0x18] sm:$0xff] }
  0x17   :  { %657 = vmatpush3.xpose.msk.msra.mxu0 %vm100_vm0, %v38_v13  ;;  %v32_v31 = vld [vmem:[%s1012_s0 + $0x20] sm:$0xff]  ;;  %v300_v32 = vld [vmem:[%s1016_s4 + $0x30] sm:$0xff]  ;;  %v31_v34 = vld [vmem:[%s1012_s0 + $0x18] sm:$0xff] }
  0x18   :  { %658 = vmatprep.subr.msk.mxu0 %vm100_vm0, %v37_v16  ;;  %v484_v33 = vld [vmem:[%s1017_s5 + $0x20] sm:$0xff]  ;;  %v301_v35 = vld [vmem:[%s1016_s4 + $0x38] sm:$0xff]  ;;  %v485_v36 = vld [vmem:[%s1017_s5 + $0x28] sm:$0xff] }
  0x19   :  { %304 = vperm.xlu0 %720, %v294_v17   ;;  %309 = vperm.xlu1 %721, %v295_v18   ;;  %v30_v37 = vld [vmem:[%s1012_s0 + $0x10] sm:$0xff]  ;;  %v487_v39 = vld [vmem:[%s1017_s5 + $0x38] sm:$0xff]  ;;  %v29_v40 = vld [vmem:[%s1012_s0 + $0x8] sm:$0xff] }
  0x1a   :  { %v486_v38 = vld [vmem:[%s1017_s5 + $0x30] sm:$0xff]  ;;  %v28_v41 = vld [vmem:[%s1012_s0] sm:$0xff]  ;;  %v45_v42 = vld [vmem:[%s1013_s1 + $0x8] sm:$0xff]  ;;  %s726_s0 = scalar_lea.vmem %s566_s2, 16 }
  0x1b   :  { %659 = vmatpush3.xpose.msk.msra.mxu0 %vm100_vm0, %v37_v16  ;;  %v46_v43 = vld [vmem:[%s1013_s1 + $0x10] sm:$0xff]  ;;  %v47_v44 = vld [vmem:[%s1013_s1 + $0x18] sm:$0xff]  ;;  %v48_v45 = vld [vmem:[%s1013_s1 + $0x20] sm:$0xff]  ;;  %p727_p0 = scmp.ne.s32.totalorder %s566_s2, %s726_s0  ;;  %p732_p2 = scmp.lt.s32.totalorder %s730_s14, %s726_s0 }
  0x1c   :  { %660 = vmatprep.subr.msk.mxu0 %vm100_vm0, %v36_v19  ;;  %v49_v46 = vld [vmem:[%s1013_s1 + $0x28] sm:$0xff]  ;;  %v50_v47 = vld [vmem:[%s1013_s1 + $0x30] sm:$0xff]  ;;  %v51_v48 = vld [vmem:[%s1013_s1 + $0x38] sm:$0xff] }
  0x1d   :  { %314 = vperm.xlu0 %720, %v296_v20   ;;  %319 = vperm.xlu1 %721, %v297_v21   ;;  %v286_v49 = vld [vmem:[%s1015_s3] sm:$0xff]  ;;  %v287_v18 = vld [vmem:[%s1015_s3 + $0x8] sm:$0xff]  ;;  %v289_v20 = vld [vmem:[%s1015_s3 + $0x18] sm:$0xff]  ;;  %p733_p3 = por %p732_p2, %p731_p1 }
  0x1e   :  { %706 = vmatprep.mubr.msk.f32.mxu1 %vm342_vm1, %v286_v49  ;;  %v290_v21 = vld [vmem:[%s1015_s3 + $0x20] sm:$0xff] }
  0x1f   :  { %661 = vmatpush3.xpose.msk.msra.mxu0 %vm100_vm0, %v36_v19  ;;  %v288_v19 = vld [vmem:[%s1015_s3 + $0x10] sm:$0xff]  ;;  %p734_p4 = pnand %p733_p3, %p727_p0 }
  0x20   :  { %662 = vmatprep.subr.msk.mxu0 %vm100_vm0, %v35_v22 }
  0x21   :  { %490 = vperm.xlu0 %720, %v480_v23   ;;  %495 = vperm.xlu1 %721, %v481_v24   ;;  %v292_v23 = vld [vmem:[%s1015_s3 + $0x30] sm:$0xff]  ;;  %v293_v24 = vld [vmem:[%s1015_s3 + $0x38] sm:$0xff] }
  0x23   :  { %663 = vmatpush3.xpose.msk.msra.mxu0 %vm100_vm0, %v35_v22  ;;  %v291_v22 = vld [vmem:[%s1015_s3 + $0x28] sm:$0xff] }
  0x24   :  { %664 = vmatprep.subr.msk.mxu0 %vm100_vm0, %v34_v25 }
  0x25   :  { %324 = vperm.xlu0 %720, %v298_v26   ;;  %500 = vperm.xlu1 %721, %v482_v27  }
  0x27   :  { %665 = vmatpush3.xpose.msk.msra.mxu0 %vm100_vm0, %v34_v25 }
  0x28   :  { %666 = vmatprep.subr.msk.mxu0 %vm100_vm0, %v33_v28 }
  0x29   :  { %329 = vperm.xlu0 %720, %v299_v29   ;;  %505 = vperm.xlu1 %721, %v483_v30  }
  0x2b   :  { %667 = vmatpush3.xpose.msk.msra.mxu0 %vm100_vm0, %v33_v28 }
  0x2c   :  { %668 = vmatprep.subr.msk.mxu0 %vm100_vm0, %v32_v31 }
  0x2d   :  { %334 = vperm.xlu0 %720, %v300_v32   ;;  %510 = vperm.xlu1 %721, %v484_v33  }
  0x2f   :  { %669 = vmatpush3.xpose.msk.msra.mxu0 %vm100_vm0, %v32_v31 }
  0x30   :  { %670 = vmatprep.subr.msk.mxu0 %vm100_vm0, %v31_v34 }
  0x31   :  { %339 = vperm.xlu0 %720, %v301_v35   ;;  %515 = vperm.xlu1 %721, %v485_v36  }
  0x33   :  { %671 = vmatpush3.xpose.msk.msra.mxu0 %vm100_vm0, %v31_v34 }
  0x34   :  { %672 = vmatprep.subr.msk.mxu0 %vm100_vm0, %v30_v37 }
  0x35   :  { %520 = vperm.xlu0 %720, %v486_v38   ;;  %525 = vperm.xlu1 %721, %v487_v39  }
  0x37   :  { %673 = vmatpush3.xpose.msk.msra.mxu0 %vm100_vm0, %v30_v37 }
  0x38   :  { %674 = vmatprep.subr.msk.mxu0 %vm100_vm0, %v29_v40 }
  0x3b   :  { %675 = vmatpush3.xpose.msk.msra.mxu0 %vm100_vm0, %v29_v40 }
  0x3c   :  { %676 = vmatprep.subr.msk.mxu0 %vm100_vm0, %v28_v41 }
  0x3f   :  { %677 = vmatpush3.xpose.msk.msra.mxu0 %vm100_vm0, %v28_v41 }
  0x42   :  { %679 = vmatmul.mubr.msk.f32.vlgmr.msra.gmra.mxu0 %vm100_vm0, %v45_v42 }
  0x43   :  { %681 = vmatprep.mubr.msk.f32.mxu0 %vm100_vm0, %v46_v43 }
  0x46   :  { %682 = vmatmul.mubr.msk.f32.gmra.mxu0 %vm100_vm0, %v47_v44 }
  0x47   :  { %684 = vmatprep.mubr.msk.f32.mxu0 %vm100_vm0, %v48_v45 }
  0x4a   :  { %685 = vmatmul.mubr.msk.f32.gmra.mxu0 %vm100_vm0, %v49_v46 }
  0x4b   :  { %687 = vmatprep.mubr.msk.f32.mxu0 %vm100_vm0, %v50_v47 }
  0x4e   :  { %688 = vmatmul.mubr.msk.f32.gmra.mxu0 %vm100_vm0, %v51_v48 }
  0x7f   :  { %v98_v52 = vpop.permute.xlu0 %97 }
  0x80   :  { %v88_v54 = vpop.permute.xlu1 %87 }
  0x83   :  { %v93_v57 = vpop.permute.xlu0 %92 }
  0x84   :  { %v83_v59 = vpop.permute.xlu1 %82 }
  0x8c   :  { %v78_v2 = vpop.permute.xlu0 %77  ;;  %v73_v5 = vpop.permute.xlu1 %72 }
  0x90   :  { %v68_v10 = vpop.permute.xlu0 %67  ;;  %v63_v13 = vpop.permute.xlu1 %62 }
  0x94   :  { %v305_v25 = vpop.permute.xlu0 %304  ;;  %v310_v26 = vpop.permute.xlu1 %309 }
  0x98   :  { %v315_v27 = vpop.permute.xlu0 %314  ;;  %v320_v28 = vpop.permute.xlu1 %319 }
  0x9c   :  { %v491_v29 = vpop.permute.xlu0 %490  ;;  %v496_v30 = vpop.permute.xlu1 %495 }
  0xa0   :  { %v325_v31 = vpop.permute.xlu0 %324  ;;  %v501_v32 = vpop.permute.xlu1 %500 }
  0xa4   :  { %v330_v33 = vpop.permute.xlu0 %329  ;;  %v506_v36 = vpop.permute.xlu1 %505 }
  0xa8   :  { %v335_v43 = vpop.permute.xlu0 %334  ;;  %v511_v47 = vpop.permute.xlu1 %510 }
 0x102   :  { %v680_v50 = vpop.f32.mrf.mxu0 }
 0x103   :  { %v245_v11 = vadd.f32 %v680_v50, %v68_v10 }
 0x104   :  { %v239_v51 = vpop.f32.mrf.mxu0 }
 0x105   :  { %v240_v14 = vadd.f32 %v239_v51, %v63_v13  ;;  %v279_v16 = vmax.f32 %v245_v11, 0.0 }
 0x106   :  { %v683_v53 = vpop.f32.mrf.mxu0 }
 0x107   :  { %v255_v6 = vadd.f32 %v683_v53, %v78_v2  ;;  %v278_v17 = vmax.f32 %v240_v14, 0.0 }
 0x108   :  { %v249_v55 = vpop.f32.mrf.mxu0 }
 0x109   :  { %v250_v8 = vadd.f32 %v249_v55, %v73_v5  ;;  %v281_v12 = vmax.f32 %v255_v6, 0.0 }
 0x10a   :  { %v686_v56 = vpop.f32.mrf.mxu0 }
 0x10b   :  { %v265_v63 = vadd.f32 %v686_v56, %v88_v54  ;;  %v280_v15 = vmax.f32 %v250_v8, 0.0 }
 0x10c   :  { %v259_v58 = vpop.f32.mrf.mxu0 }
 0x10d   :  { %v260_v3 = vadd.f32 %v259_v58, %v83_v59  ;;  %v283_v7 = vmax.f32 %v265_v63, 0.0 }
 0x10e   :  { %v689_v60 = vpop.f32.mrf.mxu0 }
 0x10f   :  { %v275_v61 = vadd.f32 %v689_v60, %v98_v52  ;;  %v282_v9 = vmax.f32 %v260_v3, 0.0 }
 0x110   :  { %v269_v62 = vpop.f32.mrf.mxu0 }
 0x111   :  { %v285_v0 = vmax.f32 %v275_v61, 0.0  ;;  %v270_v1 = vadd.f32 %v269_v62, %v93_v57  ;;  %v340_v57 = vpop.permute.xlu0 %339 }
 0x113   :  { %v284_v4 = vmax.f32 %v270_v1, 0.0  ;;  %690 = vmatprep.subr.mxu1 %v285_v0 }
 0x114   :  { %691 = vmatpush3.msra.mxu1 %v285_v0  ;;  %v516_v0 = vpop.permute.xlu1 %515 }
 0x115   :  { %692 = vmatprep.subr.mxu1 %v284_v4 }
 0x116   :  { %693 = vmatpush3.msra.mxu1 %v284_v4 }
 0x117   :  { %694 = vmatprep.subr.mxu1 %v283_v7 }
 0x118   :  { %695 = vmatpush3.msra.mxu1 %v283_v7 }
 0x119   :  { %696 = vmatprep.subr.mxu1 %v282_v9 }
 0x11a   :  { %697 = vmatpush3.msra.mxu1 %v282_v9  ;;  %v521_v9 = vpop.permute.xlu0 %520 }
 0x11b   :  { %698 = vmatprep.subr.mxu1 %v281_v12 }
 0x11c   :  { %699 = vmatpush3.msra.mxu1 %v281_v12  ;;  %v526_v12 = vpop.permute.xlu1 %525 }
 0x11d   :  { %700 = vmatprep.subr.mxu1 %v280_v15 }
 0x11e   :  { %701 = vmatpush3.msra.mxu1 %v280_v15 }
 0x11f   :  { %702 = vmatprep.subr.mxu1 %v279_v16 }
 0x120   :  { %703 = vmatpush3.msra.mxu1 %v279_v16 }
 0x121   :  { %704 = vmatprep.subr.mxu1 %v278_v17 }
 0x122   :  { %705 = vmatpush3.msra.mxu1 %v278_v17 }
 0x123   :  { %707 = vmatmul.mubr.msk.f32.vlgmr.msra.gmra.mxu1 %vm342_vm1, %v287_v18 }
 0x124   :  { %709 = vmatprep.mubr.msk.f32.mxu1 %vm342_vm1, %v288_v19 }
 0x127   :  { %710 = vmatmul.mubr.msk.f32.gmra.mxu1 %vm342_vm1, %v289_v20 }
 0x128   :  { %712 = vmatprep.mubr.msk.f32.mxu1 %vm342_vm1, %v290_v21  ;;  %v550_v21 = vstv %s1018_s6 }
 0x12b   :  { %713 = vmatmul.mubr.msk.f32.gmra.mxu1 %vm342_vm1, %v291_v22 }
 0x12c   :  { %715 = vmatprep.mubr.msk.f32.mxu1 %vm342_vm1, %v292_v23 }
 0x12f   :  { %716 = vmatmul.mubr.msk.f32.gmra.mxu1 %vm342_vm1, %v293_v24 }
 0x1e3   :  { %v708_v34 = vpop.f32.mrf.mxu1 }
 0x1e4   :  { %v439_v35 = vadd.f32 %v708_v34, %v310_v26 }
 0x1e5   :  { %v433_v37 = vpop.f32.mrf.mxu1 }
 0x1e6   :  { %v434_v38 = vadd.f32 %v433_v37, %v305_v25  ;;  %v473_v40 = vmax.f32 %v439_v35, 0.0 }
 0x1e7   :  { %v711_v39 = vpop.f32.mrf.mxu1 }
 0x1e8   :  { %v472_v41 = vmax.f32 %v434_v38, 0.0  ;;  %v449_v42 = vadd.f32 %v711_v39, %v320_v28  ;;  %v529_v50 = vmul.f32 %v496_v30, %v473_v40 }
 0x1e9   :  { %v443_v44 = vpop.f32.mrf.mxu1 }
 0x1ea   :  { %v528_v45 = vmul.f32 %v491_v29, %v472_v41  ;;  %v444_v46 = vadd.f32 %v443_v44, %v315_v27  ;;  %v475_v48 = vmax.f32 %v449_v42, 0.0 }
 0x1eb   :  { %v714_v49 = vpop.f32.mrf.mxu1 }
 0x1ec   :  { %v474_v51 = vmax.f32 %v444_v46, 0.0  ;;  %v459_v52 = vadd.f32 %v714_v49, %v330_v33  ;;  %v536_v54 = vadd.f32 %v529_v50, %v528_v45  ;;  %v531_v58 = vmul.f32 %v506_v36, %v475_v48 }
 0x1ed   :  { %v453_v53 = vpop.f32.mrf.mxu1 }
 0x1ee   :  { %v530_v55 = vmul.f32 %v501_v32, %v474_v51  ;;  %v454_v56 = vadd.f32 %v453_v53, %v325_v31  ;;  %v477_v61 = vmax.f32 %v459_v52, 0.0 }
 0x1ef   :  { %v717_v59 = vpop.f32.mrf.mxu1 }
 0x1f0   :  { %v537_v60 = vadd.f32 %v536_v54, %v530_v55  ;;  %v476_v62 = vmax.f32 %v454_v56, 0.0  ;;  %v469_v63 = vadd.f32 %v717_v59, %v340_v57  ;;  %v533_v5 = vmul.f32 %v516_v0, %v477_v61 }
 0x1f1   :  { %v463_v1 = vpop.f32.mrf.mxu1 }
 0x1f2   :  { %v532_v2 = vmul.f32 %v511_v47, %v476_v62  ;;  %v538_v3 = vadd.f32 %v537_v60, %v531_v58  ;;  %v464_v4 = vadd.f32 %v463_v1, %v335_v43  ;;  %v479_v7 = vmax.f32 %v469_v63, 0.0 }
 0x1f4   :  { %v539_v6 = vadd.f32 %v538_v3, %v532_v2  ;;  %v478_v8 = vmax.f32 %v464_v4, 0.0  ;;  %v535_v13 = vmul.f32 %v526_v12, %v479_v7 }
 0x1f6   :  { %v534_v10 = vmul.f32 %v521_v9, %v478_v8  ;;  %v540_v11 = vadd.f32 %v539_v6, %v533_v5 }
 0x1f8   :  { %v541_v14 = vadd.f32 %v540_v11, %v534_v10 }
 0x1fa   :  { %v542_v15 = vadd.f32 %v541_v14, %v535_v13 }
 0x1fc   :  { %v543_v16 = vrot.slane %v542_v15, 4 }
 0x1fe   :  { %v544_v17 = vadd.f32 %v543_v16, %v542_v15 }
 0x200   :  { %v545_v18 = vrot.slane %v544_v17, 2 }
 0x202   :  { %v546_v19 = vadd.f32 %v545_v18, %v544_v17 }
 0x204   :  { %v547_v20 = vrot.slane %v546_v19, 1 }
 0x206   :  { %v548_v22 = vadd.f32 %v547_v20, %v546_v19 }
 0x208   :  { %v551_v23 = vadd.f32 %v550_v21, %v548_v22 }
 0x20a   :  { %v605_v24 = vmul.f32 -1.442695, %v551_v23 }
 0x20c   :  { %722 = vpow2.f32 %v605_v24 }
 0x219   :  { %v723_v25 = vpop.eup %722 }
 0x21a   :  { %v555_v26 = vadd.f32 1.0, %v723_v25 }
 0x21c   :  { %724 = vrcp.f32 %v555_v26 }
 0x229   :  { %v725_v27 = vpop.eup %724 }
 0x22a   :  { %558 = vst [vmem:[#allocation3] sm:$0x1] %v725_v27 }
 0x22b   :  { %737 = shalt.err (!%p734_p4)
}
 0x22c   :  { %568 = dma.vmem_to_hbm [thread:$0]  %s566_s2, 16, %s1019_s7, [#allocation4]  }
 0x22d   :  { %746 = dma.done.wait [#allocation4], 16  }
 0x22e   :  { %747 = vsyncadd [#allocation4], 4294967280 }
 0x22f   :  { %572 = vsyncpa [#allocation4], 1 }

</bundles_post_ra>
